<compile_context>
chip_gen: v5e
topology: v5e:2x2
jax: 0.10.0
libtpu: 0.0.40
codegen_flags: <defaults>
</compile_context>

<pallas_src>
import functools
import math

import jax
import jax.numpy as jnp
from jax.experimental import pallas as pl
from jax.experimental.pallas import tpu as pltpu

# --- ArcMarginLoss constants (defaults of the PyTorch module) ---
S = 32.0
M = 0.4
WAYS = 10
COS_M = math.cos(M)
SIN_M = math.sin(M)
TH = math.cos(math.pi - M)
MM = math.sin(math.pi - M) * M
EPS_ARC = 1e-6            # self.eps in ArcMarginLoss
GAMMA = 2                 # FocalLoss gamma
EASY_MARGIN = False
NORM_EPS = 1e-12          # F.normalize eps
NORM_EPS_SQ = NORM_EPS * NORM_EPS


# ----------------------------------------------------------------------------------------
# Shared in-kernel epilogue: ArcFace margin + softmax CE on a transposed (W, bb) tile.
# ----------------------------------------------------------------------------------------
def _tile_ce_t(cos_t, lab, row_start, true_b):
    """Per-lane CE contribution of one (W, bb) cosine tile, returned as (1, bb).

    cos_t:     (W, bb) f32 cosine; classes on sublanes, batch rows on lanes.
    lab:       (1, bb) int32 labels.
    row_start: traced scalar, global batch index of lane 0 of this tile.
    true_b:    static int, real (unpadded) batch size; padded lanes contribute 0.
    """
    w_, bb = cos_t.shape
    cls = jax.lax.broadcasted_iota(jnp.int32, (w_, bb), 0)          # class ids on sublanes
    is_tgt = cls == lab                                             # (W, bb) bool

    # Target-class cosine per row: single-hot sum over the 10 class sublanes.
    tgt_c = jnp.sum(jnp.where(is_tgt, cos_t, 0.0), axis=0, keepdims=True)     # (1, bb)

    # ArcFace margin only on the (1, bb) target vector (EUP sqrt over bb/128 vregs).
    sine = jnp.sqrt(jnp.maximum(1.0 - tgt_c * tgt_c, 0.0) + EPS_ARC)
    cos_phi = tgt_c * COS_M - sine * SIN_M
    if EASY_MARGIN:
        cos_phi = jnp.where(tgt_c > 0.0, cos_phi, tgt_c)
    else:
        cos_phi = jnp.where(tgt_c > TH, cos_phi, tgt_c - MM)
    delta = cos_phi - tgt_c                                                    # (1, bb)

    # metric = one_hot*cos_phi + (1-one_hot)*cosine == cosine + one_hot*delta, scaled by s.
    # The FocalLoss eps (1e-10) shifts every logit equally and cancels exactly in
    # log-softmax, so it is dropped.
    logits = (cos_t + jnp.where(is_tgt, delta, 0.0)) * S                       # (W, bb)

    # No max-subtraction: |logits| <= S*(1+MM) ~ 44 for the module defaults, exp safe in f32.
    lse = jnp.log(jnp.sum(jnp.exp(logits), axis=0, keepdims=True))             # (1, bb)
    ce = lse - (tgt_c + delta) * S                                             # (1, bb)

    # Zero-out padded rows so they do not bias the mean.
    lane = jax.lax.broadcasted_iota(jnp.int32, (1, bb), 1)
    return jnp.where(row_start + lane < true_b, ce, 0.0)


def _write_partial(acc_ref, out_ref):
    # Single cross-lane reduction, only at the last step; lane-dense (1, 128) store.
    total = jnp.sum(acc_ref[...], axis=1, keepdims=True)                       # (1, 1)
    out_ref[...] = jnp.broadcast_to(total, out_ref.shape)                      # (1, 128)


# ----------------------------------------------------------------------------------------
# Kernel 1: module-equivalent forward -- takes the precomputed cosine matrix (transposed).
# ----------------------------------------------------------------------------------------
def arc_margin_cos_kernel(cos_t_ref, lab_ref, out_ref, acc_ref, *, true_b):
    c = pl.program_id(0)
    i = pl.program_id(1)
    n_inner = pl.num_programs(1)

    @pl.when(i == 0)
    def _init():
        acc_ref[...] = jnp.zeros_like(acc_ref)

    bb = cos_t_ref.shape[1]
    row_start = (c * n_inner + i) * bb
    acc_ref[...] += _tile_ce_t(cos_t_ref[...].astype(jnp.float32),
                               lab_ref[...], row_start, true_b)

    @pl.when(i == n_inner - 1)
    def _fin():
        _write_partial(acc_ref, out_ref)


# ----------------------------------------------------------------------------------------
# Kernel 2: fused forward -- normalize(x) @ normalize(w).T on the MXU, directly producing the
# cosine tile in the transposed (W, bb) layout, then the same margin/CE epilogue.
# ----------------------------------------------------------------------------------------
def arc_margin_fused_kernel(x_ref, w_ref, lab_ref, out_ref, wn_ref, acc_ref, *, true_b):
    c = pl.program_id(0)
    i = pl.program_id(1)
    n_inner = pl.num_programs(1)

    @pl.when(i == 0)
    def _init():
        # Normalize the small, resident class-weight matrix once per core, not per tile.
        w = w_ref[...].astype(jnp.float32)                                     # (W, H)
        ssw = jnp.sum(w * w, axis=-1, keepdims=True)                           # (W, 1)
        wn_ref[...] = w * jax.lax.rsqrt(jnp.maximum(ssw, NORM_EPS_SQ))
        acc_ref[...] = jnp.zeros_like(acc_ref)

    x = x_ref[...].astype(jnp.float32)                                         # (bb, H)
    ssx = jnp.sum(x * x, axis=-1, keepdims=True)                               # (bb, 1)
    xn = x * jax.lax.rsqrt(jnp.maximum(ssx, NORM_EPS_SQ))                      # rsqrt: EUP slot

    # cosine in transposed (W, bb) layout: classes on sublanes, batch rows on lanes.
    cos_t = jax.lax.dot_general(wn_ref[...], xn, (((1,), (1,)), ((), ())),
                                preferred_element_type=jnp.float32)            # (W, bb)

    bb = x_ref.shape[0]
    row_start = (c * n_inner + i) * bb
    acc_ref[...] += _tile_ce_t(cos_t, lab_ref[...], row_start, true_b)

    @pl.when(i == n_inner - 1)
    def _fin():
        _write_partial(acc_ref, out_ref)


# ----------------------------------------------------------------------------------------
# Wrappers: tiling / padding / megacore split / focal finalize.
# ----------------------------------------------------------------------------------------
def _round_up(x, m):
    return -(-x // m) * m


def _pick_bb(batch, row_bytes, budget_bytes=16 << 20, max_bb=8192):
    """Largest multiple-of-128 batch tile whose double-buffered input fits the VMEM budget."""
    bb = (budget_bytes // max(1, 2 * row_bytes)) // 128 * 128
    bb = max(128, min(max_bb, bb))
    return min(bb, _round_up(batch, 128))


def _grid_layout(batch, bb, num_cores):
    n_tiles = -(-batch // bb)
    num_chunks = num_cores if n_tiles >= num_cores else 1       # v7x: one chunk per TC
    n_inner = -(-n_tiles // num_chunks)
    return num_chunks, n_inner, num_chunks * n_inner * bb       # (chunks, inner tiles, padded B)


def _focal(ce_sum, batch):
    L = ce_sum / batch                         # mean CE over the true batch
    p = jnp.exp(-L)
    return (1.0 - p) ** GAMMA * L


def arc_margin_loss(cosine, label, *, block_b=None, num_cores=2):
    """Module-equivalent forward: ArcMarginLoss()(cosine, label) -> scalar f32 loss."""
    B, W = cosine.shape
    bb = _pick_bb(B, W * 4) if block_b is None else block_b
    assert bb % 128 == 0, "block_b must be a multiple of 128"
    num_chunks, n_inner, b_pad = _grid_layout(B, bb, num_cores)

    # Pad to the tile grid and transpose once so batch sits on lanes / classes on sublanes.
    cos_t = jnp.pad(cosine, ((0, b_pad - B), (0, 0))).T                        # (W, b_pad)
    lab = jnp.pad(label.astype(jnp.int32), (0, b_pad - B)).reshape(1, b_pad)

    kern = functools.partial(arc_margin_cos_kernel, true_b=B)
    out = pl.pallas_call(
        kern,
        out_shape=jax.ShapeDtypeStruct((1, num_chunks * 128), jnp.float32),
        grid=(num_chunks, n_inner),
        in_specs=[
            pl.BlockSpec((W, bb), lambda c, i: (0, c * n_inner + i)),
            pl.BlockSpec((1, bb), lambda c, i: (0, c * n_inner + i)),
        ],
        out_specs=pl.BlockSpec((1, 128), lambda c, i: (0, c)),
        scratch_shapes=[pltpu.VMEM((1, bb), jnp.float32)],
        compiler_params=pltpu.CompilerParams(
            dimension_semantics=("parallel", "arbitrary"),
            vmem_limit_bytes=32 << 20,
        ),
        cost_estimate=pl.CostEstimate(
            flops=12 * B * W,
            transcendentals=B * W + 3 * B,
            bytes_accessed=(B * W + B) * 4,
        ),
    )(cos_t, lab)

    partials = out.reshape(num_chunks, 128)[:, 0]
    return _focal(jnp.sum(partials), B)


def arc_margin_loss_fused(x, w, label, *, block_b=None, num_cores=2):
    """Fused forward: ArcMarginLoss()(cosine(x, w), label), normalize + matmul done in-kernel."""
    B, H = x.shape
    W, _ = w.shape
    row_bytes = H * jnp.dtype(x.dtype).itemsize
    bb = _pick_bb(B, row_bytes) if block_b is None else block_b
    assert bb % 128 == 0, "block_b must be a multiple of 128"
    num_chunks, n_inner, b_pad = _grid_layout(B, bb, num_cores)

    # Ship x / w in their native dtype (bf16 stays bf16 over HBM); cast happens in-kernel.
    x_pad = jnp.pad(x, ((0, b_pad - B), (0, 0)))
    lab = jnp.pad(label.astype(jnp.int32), (0, b_pad - B)).reshape(1, b_pad)

    kern = functools.partial(arc_margin_fused_kernel, true_b=B)
    out = pl.pallas_call(
        kern,
        out_shape=jax.ShapeDtypeStruct((1, num_chunks * 128), jnp.float32),
        grid=(num_chunks, n_inner),
        in_specs=[
            pl.BlockSpec((bb, H), lambda c, i: (c * n_inner + i, 0)),
            pl.BlockSpec((W, H), lambda c, i: (0, 0)),
            pl.BlockSpec((1, bb), lambda c, i: (0, c * n_inner + i)),
        ],
        out_specs=pl.BlockSpec((1, 128), lambda c, i: (0, c)),
        scratch_shapes=[
            pltpu.VMEM((W, H), jnp.float32),     # normalized class weights (computed once)
            pltpu.VMEM((1, bb), jnp.float32),    # per-lane CE partial sums
        ],
        compiler_params=pltpu.CompilerParams(
            dimension_semantics=("parallel", "arbitrary"),
            vmem_limit_bytes=32 << 20,
        ),
        cost_estimate=pl.CostEstimate(
            flops=2 * B * H * W + 4 * B * H + 12 * B * W,
            transcendentals=B * W + 4 * B,
            bytes_accessed=B * row_bytes + W * row_bytes + B * 4,
        ),
    )(x_pad, w, lab)

    partials = out.reshape(num_chunks, 128)[:, 0]
    return _focal(jnp.sum(partials), B)


# --- plain-JAX glue + reference mirroring the PyTorch module, for the sanity check ---
def cosine_sim(x, w):
    xn = x / jnp.maximum(jnp.linalg.norm(x, axis=-1, keepdims=True), NORM_EPS)
    wn = w / jnp.maximum(jnp.linalg.norm(w, axis=-1, keepdims=True), NORM_EPS)
    return xn @ wn.T


def reference_loss(cosine, label):
    c = cosine.astype(jnp.float32)
    sine = jnp.sqrt(1.0 - c * c + EPS_ARC)
    cos_phi = c * COS_M - sine * SIN_M
    cos_phi = jnp.where(c > TH, cos_phi, c - MM)
    one_hot = jax.nn.one_hot(label, WAYS, dtype=jnp.float32)
    metric = (one_hot * cos_phi + (1.0 - one_hot) * c) * S
    logits = metric + 1e-10
    logp = jax.nn.log_softmax(logits, axis=-1)
    L = -jnp.mean(jnp.sum(one_hot * logp, axis=-1))
    p = jnp.exp(-L)
    return (1.0 - p) ** GAMMA * L


if __name__ == "__main__":
    key = jax.random.PRNGKey(0)
    kx, kw, kl, kx2, kl2 = jax.random.split(key, 5)

    # Small shapes consistent with the module: few-shot episode, 10-way head.
    B, HIDDEN = 8, 32
    x = jax.random.normal(kx, (B, HIDDEN), dtype=jnp.float32)          # embeddings
    w = jax.random.normal(kw, (WAYS, HIDDEN), dtype=jnp.float32)       # class weights
    label = jax.random.randint(kl, (B,), 0, WAYS, dtype=jnp.int32)

    cos = cosine_sim(x, w)                                             # (B, WAYS)
    ref = reference_loss(cos, label)

    # 1) module-equivalent kernel (forward(cosine, label))
    loss = jax.block_until_ready(arc_margin_loss(cos, label))
    assert jnp.allclose(loss, ref, atol=2e-4, rtol=2e-4), (loss, ref)

    # 2) fused kernel (normalize + cosine matmul on the MXU inside the kernel)
    loss_fused = jax.block_until_ready(arc_margin_loss_fused(x, w, label))
    assert jnp.allclose(loss_fused, ref, atol=2e-4, rtol=2e-4), (loss_fused, ref)

    # 3) multi-tile / multi-chunk / ragged-tail path (B not a multiple of the tile).
    B2 = 300
    x2 = jax.random.normal(kx2, (B2, HIDDEN), dtype=jnp.float32)
    label2 = jax.random.randint(kl2, (B2,), 0, WAYS, dtype=jnp.int32)
    cos2 = cosine_sim(x2, w)
    ref2 = reference_loss(cos2, label2)

    loss2 = jax.block_until_ready(arc_margin_loss(cos2, label2, block_b=128))
    assert jnp.allclose(loss2, ref2, atol=2e-4, rtol=2e-4), (loss2, ref2)

    loss2_fused = jax.block_until_ready(arc_margin_loss_fused(x2, w, label2, block_b=128))
    assert jnp.allclose(loss2_fused, ref2, atol=2e-4, rtol=2e-4), (loss2_fused, ref2)

    print("KERNEL_OK")
</pallas_src>

<mosaic_0001>
module attributes {stable_mosaic.version = 11 : i64} {
  func.func @arc_margin_cos_kernel(%arg0: i32, %arg1: i32, %arg2: memref<10x128xf32, #tpu.memory_space<vmem>>, %arg3: memref<1x128xi32, #tpu.memory_space<vmem>>, %arg4: memref<1x128xf32, #tpu.memory_space<vmem>>, %arg5: memref<1x128xf32, #tpu.memory_space<vmem>>) attributes {dimension_semantics = [#tpu.dimension_semantics<parallel>, #tpu.dimension_semantics<arbitrary>], iteration_bounds = array<i64: 1, 1>, scalar_prefetch = 0 : i64, scratch_operands = 1 : i64, tpu.core_type = #tpu.core_type<tc>, window_params = [{transform_indices = @transform_0, window_bounds = array<i64: 10, 128>}, {transform_indices = @transform_1, window_bounds = array<i64: 1, 128>}, {transform_indices = @transform_2, window_bounds = array<i64: 1, 128>}]} {
    %c0_i32 = arith.constant 0 : i32
    %0 = arith.cmpi eq, %arg1, %c0_i32 : i32
    %1 = arith.extui %0 : i1 to i32
    %c0_i32_0 = arith.constant 0 : i32
    %2 = arith.cmpi ne, %1, %c0_i32_0 : i32
    scf.if %2 {
      %cst_23 = arith.constant 0.000000e+00 : f32
      %62 = vector.broadcast %cst_23 : f32 to vector<1x128xf32>
      %c0_24 = arith.constant 0 : index
      %c0_25 = arith.constant 0 : index
      %63 = vector.load %arg5[%c0_24, %c0_25] : memref<1x128xf32, #tpu.memory_space<vmem>>, vector<1x128xf32>
      tpu.vector_store %arg5[%c0_24, %c0_25], %62 {strides = array<i32>} : memref<1x128xf32, #tpu.memory_space<vmem>>, vector<1x128xf32>,
    } else {
    }
    %c1_i32 = arith.constant 1 : i32
    %3 = arith.muli %arg0, %c1_i32 : i32
    %4 = arith.addi %3, %arg1 : i32
    %c128_i32 = arith.constant 128 : i32
    %5 = arith.muli %4, %c128_i32 : i32
    %c0 = arith.constant 0 : index
    %c0_1 = arith.constant 0 : index
    %6 = vector.load %arg5[%c0, %c0_1] : memref<1x128xf32, #tpu.memory_space<vmem>>, vector<1x128xf32>
    %c0_2 = arith.constant 0 : index
    %c0_3 = arith.constant 0 : index
    %7 = vector.load %arg2[%c0_2, %c0_3] : memref<10x128xf32, #tpu.memory_space<vmem>>, vector<10x128xf32>
    %c0_4 = arith.constant 0 : index
    %c0_5 = arith.constant 0 : index
    %8 = vector.load %arg3[%c0_4, %c0_5] : memref<1x128xi32, #tpu.memory_space<vmem>>, vector<1x128xi32>
    %9 = tpu.iota {dimensions = array<i32: 0>} : vector<10x128xi32>
    %10 = vector.broadcast %8 : vector<1x128xi32> to vector<10x128xi32>
    %11 = arith.cmpi eq, %9, %10 : vector<10x128xi32>
    %cst = arith.constant 0.000000e+00 : f32
    %12 = vector.broadcast %cst : f32 to vector<10x128xf32>
    %13 = arith.select %11, %7, %12 : vector<10x128xi1>, vector<10x128xf32>
    %cst_6 = arith.constant dense<0.000000e+00> : vector<128xf32>
    %14 = vector.multi_reduction <add>, %13, %cst_6 [0] : vector<10x128xf32> to vector<128xf32>
    %15 = vector.shape_cast %14 : vector<128xf32> to vector<1x128xf32>
    %16 = arith.mulf %15, %15 : vector<1x128xf32>
    %cst_7 = arith.constant 1.000000e+00 : f32
    %17 = vector.broadcast %cst_7 : f32 to vector<1x128xf32>
    %18 = arith.subf %17, %16 : vector<1x128xf32>
    %cst_8 = arith.constant 0.000000e+00 : f32
    %19 = vector.broadcast %cst_8 : f32 to vector<1x128xf32>
    %20 = arith.maximumf %18, %19 : vector<1x128xf32>
    %cst_9 = arith.constant 9.99999997E-7 : f32
    %21 = vector.broadcast %cst_9 : f32 to vector<1x128xf32>
    %22 = arith.addf %20, %21 : vector<1x128xf32>
    %23 = math.sqrt %22 : vector<1x128xf32>
    %cst_10 = arith.constant 0.921060979 : f32
    %24 = vector.broadcast %cst_10 : f32 to vector<1x128xf32>
    %25 = arith.mulf %15, %24 : vector<1x128xf32>
    %cst_11 = arith.constant 0.389418334 : f32
    %26 = vector.broadcast %cst_11 : f32 to vector<1x128xf32>
    %27 = arith.mulf %23, %26 : vector<1x128xf32>
    %28 = arith.subf %25, %27 : vector<1x128xf32>
    %cst_12 = arith.constant -0.921060979 : f32
    %29 = vector.broadcast %cst_12 : f32 to vector<1x128xf32>
    %30 = arith.cmpf ogt, %15, %29 : vector<1x128xf32>
    %cst_13 = arith.constant 0.155767336 : f32
    %31 = vector.broadcast %cst_13 : f32 to vector<1x128xf32>
    %32 = arith.subf %15, %31 : vector<1x128xf32>
    %33 = arith.select %30, %28, %32 : vector<1x128xi1>, vector<1x128xf32>
    %34 = arith.subf %33, %15 : vector<1x128xf32>
    %cst_14 = arith.constant 0.000000e+00 : f32
    %35 = vector.shape_cast %34 : vector<1x128xf32> to vector<1x128xf32>
    %36 = vector.broadcast %35 : vector<1x128xf32> to vector<10x128xf32>
    %37 = vector.broadcast %cst_14 : f32 to vector<10x128xf32>
    %38 = arith.select %11, %36, %37 : vector<10x128xi1>, vector<10x128xf32>
    %39 = arith.addf %7, %38 : vector<10x128xf32>
    %cst_15 = arith.constant 3.200000e+01 : f32
    %40 = vector.broadcast %cst_15 : f32 to vector<10x128xf32>
    %41 = arith.mulf %39, %40 : vector<10x128xf32>
    %42 = math.exp %41 : vector<10x128xf32>
    %cst_16 = arith.constant dense<0.000000e+00> : vector<128xf32>
    %43 = vector.multi_reduction <add>, %42, %cst_16 [0] : vector<10x128xf32> to vector<128xf32>
    %44 = vector.shape_cast %43 : vector<128xf32> to vector<1x128xf32>
    %45 = math.log %44 : vector<1x128xf32>
    %46 = arith.addf %15, %34 : vector<1x128xf32>
    %cst_17 = arith.constant 3.200000e+01 : f32
    %47 = vector.broadcast %cst_17 : f32 to vector<1x128xf32>
    %48 = arith.mulf %46, %47 : vector<1x128xf32>
    %49 = arith.subf %45, %48 : vector<1x128xf32>
    %50 = tpu.iota {dimensions = array<i32: 1>} : vector<1x128xi32>
    %51 = vector.broadcast %5 : i32 to vector<1x128xi32>
    %52 = arith.addi %51, %50 : vector<1x128xi32>
    %c8_i32 = arith.constant 8 : i32
    %53 = vector.broadcast %c8_i32 : i32 to vector<1x128xi32>
    %54 = arith.cmpi slt, %52, %53 : vector<1x128xi32>
    %cst_18 = arith.constant 0.000000e+00 : f32
    %55 = vector.broadcast %cst_18 : f32 to vector<1x128xf32>
    %56 = arith.select %54, %49, %55 : vector<1x128xi1>, vector<1x128xf32>
    %57 = arith.addf %6, %56 : vector<1x128xf32>
    %c0_19 = arith.constant 0 : index
    %c0_20 = arith.constant 0 : index
    %58 = vector.load %arg5[%c0_19, %c0_20] : memref<1x128xf32, #tpu.memory_space<vmem>>, vector<1x128xf32>
    tpu.vector_store %arg5[%c0_19, %c0_20], %57 {strides = array<i32>} : memref<1x128xf32, #tpu.memory_space<vmem>>, vector<1x128xf32>,
    %c0_i32_21 = arith.constant 0 : i32
    %59 = arith.cmpi eq, %arg1, %c0_i32_21 : i32
    %60 = arith.extui %59 : i1 to i32
    %c0_i32_22 = arith.constant 0 : i32
    %61 = arith.cmpi ne, %60, %c0_i32_22 : i32
    scf.if %61 {
      %c0_23 = arith.constant 0 : index
      %c0_24 = arith.constant 0 : index
      %62 = vector.load %arg5[%c0_23, %c0_24] : memref<1x128xf32, #tpu.memory_space<vmem>>, vector<1x128xf32>
      %cst_25 = arith.constant dense<0.000000e+00> : vector<1xf32>
      %63 = vector.multi_reduction <add>, %62, %cst_25 [1] : vector<1x128xf32> to vector<1xf32>
      %64 = vector.shape_cast %63 : vector<1xf32> to vector<1x1xf32>
      %65 = vector.shape_cast %64 : vector<1x1xf32> to vector<1x1xf32>
      %66 = vector.broadcast %65 : vector<1x1xf32> to vector<1x128xf32>
      %c0_26 = arith.constant 0 : index
      %c0_27 = arith.constant 0 : index
      %67 = vector.load %arg4[%c0_26, %c0_27] : memref<1x128xf32, #tpu.memory_space<vmem>>, vector<1x128xf32>
      tpu.vector_store %arg4[%c0_26, %c0_27], %66 {strides = array<i32>} : memref<1x128xf32, #tpu.memory_space<vmem>>, vector<1x128xf32>,
    } else {
    }
    return
  }
  func.func @transform_0(%arg0: i32, %arg1: i32) -> (i32, i32) {
    %c1_i32 = arith.constant 1 : i32
    %0 = arith.muli %arg0, %c1_i32 : i32
    %1 = arith.addi %0, %arg1 : i32
    %c0_i32 = arith.constant 0 : i32
    %c0_i32_0 = arith.constant 0 : i32
    return %c0_i32, %1 : i32, i32
  }
  func.func @transform_1(%arg0: i32, %arg1: i32) -> (i32, i32) {
    %c1_i32 = arith.constant 1 : i32
    %0 = arith.muli %arg0, %c1_i32 : i32
    %1 = arith.addi %0, %arg1 : i32
    %c0_i32 = arith.constant 0 : i32
    %c0_i32_0 = arith.constant 0 : i32
    return %c0_i32, %1 : i32, i32
  }
  func.func @transform_2(%arg0: i32, %arg1: i32) -> (i32, i32) {
    %c0_i32 = arith.constant 0 : i32
    %c0_i32_0 = arith.constant 0 : i32
    return %c0_i32, %arg0 : i32, i32
  }
}

</mosaic_0001>

<bundles_post_ra>
// kernel: tpu_custom_call.1
= control target key start
LH: loop header
LB: loop body
LE: loop exit
PB: predicated region body
PF: predicated region fallthrough
CT: control target
= control target key end

     0   :  { %7 = vsyncpa [#allocation4], 0  ;;  %s290_s0 = inlined_call_operand.hbm [shape: f32[10,128], index: 0, kind: input, shape index: {}]   ;;  %s291_s1 = inlined_call_operand.hbm [shape: s32[1,128], index: 1, kind: input, shape index: {}]   ;;  %s292_s2 = inlined_call_operand.hbm [shape: f32[1,128], index: 2, kind: output, shape index: {}]  }
   0x1   :  { %8 = vsyncpa [#allocation7], 0 }
   0x2   :  { %9 = vsyncpa [#allocation5], 0  ;;  %s17_s11 = sshll.u32 %s290_s0, 4  ;;  %s252_s12 = smov [#allocation3]   ;;  %s18_s11 = int_to_ptr.hbm [resolvable:$true] %s17_s11 }
   0x3   :  { %s19_s13 = sshll.u32 %s252_s12, 4  ;;  %s33_s16 = sshll.u32 %s291_s1, 4  ;;  %s20_s13 = int_to_ptr.vmem [resolvable:$true] %s19_s13  ;;  %s34_s16 = int_to_ptr.hbm [resolvable:$true] %s33_s16 }
   0x4   :  { %s253_s17 = smov 128   ;;  %s254_s18 = smov 8  }
   0x5   :  { %25 = dma.hbm_to_vmem [thread:$0]  %s18_s11, 256, %s20_s13, [#allocation4], %s253_s17, %s253_s17, %s254_s18  }
   0x6   :  { %s255_s19 = smov [#allocation6]  }
   0x7   :  { %s35_s20 = sshll.u32 %s255_s19, 4  ;;  %s36_s20 = int_to_ptr.vmem [resolvable:$true] %s35_s20 }
   0x8   :  { %38 = dma.hbm_to_vmem [thread:$0]  %s34_s16, 16, %s36_s20, [#allocation7]  }
   0x9   :  { %246 = dma.done.wait [#allocation4], 256  }
   0xa   :  { %247 = vsyncadd [#allocation4], 4294967040 }
   0xb   :  { %248 = dma.done.wait [#allocation7], 16  }
   0xc   :  { %249 = vsyncadd [#allocation7], 4294967280  ;;  %v60_v0 = vlaneseq  ;;  %v256_v1 = vmov 0.0   ;;  %v57_v4 = vld [vmem:[#allocation3] sm:$0xff]  ;;  %v58_v5 = vld [vmem:[#allocation3 + $0x8] sm:$0x3] }
   0xd   :  { %53 = vst [vmem:[#allocation2] sm:$0x1] %v256_v1  ;;  %v165_v6 = vld [vmem:[#allocation6] ss:$0 sm:$0xff]  ;;  %vm68_vm0 = vcmask 1041408   ;;  %vm135_vm7 = vcmask 1040384  }
   0xe   :  { %v61_v2 = vshrl.u32 %v60_v0, 7  ;;  %v124_v56 = vand.u32 127, %v60_v0  ;;  %s257_s0 = smov [#allocation8]   ;;  %s147_s23 = sshll.u32 %s292_s2, 4  ;;  %s148_s23 = int_to_ptr.hbm [resolvable:$true] %s147_s23 }
   0xf   :  { %s145_s1 = sshll.u32 %s257_s0, 4  ;;  %s146_s1 = int_to_ptr.vmem [resolvable:$true] %s145_s1 }
  0x10   :  { %v62_v3 = vadd.s32 8, %v61_v2  ;;  %vm64_vm1 = vcmp.eq.s32.totalorder %v61_v2, %v165_v6  ;;  %vm127_vm6 = vcmp.lt.s32.totalorder %v124_v56, 8 }
  0x11   :  { %v66_v7 = vsel %vm64_vm1, %v57_v4, 0.0 }
  0x12   :  { %vm65_vm2 = vcmp.eq.s32.totalorder %v62_v3, %v165_v6 }
  0x13   :  { %v67_v8 = vsel %vm65_vm2, %v58_v5, 0.0 }
  0x14   :  { %v69_v9 = vsel %vm68_vm0, %v67_v8, 0.0  ;;  %v56_v60 = vld [vmem:[#allocation2] sm:$0x1] }
  0x15   :  { %v70_v10 = vadd.f32 %v69_v9, %v66_v7 }
  0x17   :  { %v71_v11 = vrot.slane %v70_v10, 4 }
  0x19   :  { %v72_v12 = vadd.f32 %v71_v11, %v70_v10 }
  0x1b   :  { %v73_v13 = vrot.slane %v72_v12, 2 }
  0x1d   :  { %v74_v14 = vadd.f32 %v73_v13, %v72_v12 }
  0x1f   :  { %v75_v15 = vrot.slane %v74_v14, 1 }
  0x21   :  { %v76_v16 = vadd.f32 %v75_v15, %v74_v14 }
  0x23   :  { %v77_v17 = vmul.f32 %v76_v16, %v76_v16  ;;  %v93_v30 = vmul.f32 0.921061, %v76_v16  ;;  %v158_v33 = vadd.f32 -0.15576734, %v76_v16  ;;  %vm96_vm5 = vcmp.gt.f32.partialorder %v76_v16, -0.921061 }
  0x25   :  { %v78_v18 = vsub.f32 1.0, %v77_v17 }
  0x27   :  { %v79_v19 = vmax.f32 %v78_v18, 0.0 }
  0x29   :  { %v80_v20 = vadd.f32 1e-06, %v79_v19 }
  0x2b   :  { %166 = vrsqrt.f32 %v80_v20  ;;  %vm88_vm3 = vcmp.eq.f32.partialorder %v80_v20, inf  ;;  %v91_v27 = vand.u32 2147483648, %v80_v20  ;;  %vm90_vm4 = vcmp.eq.f32.partialorder %v80_v20, 0.0 }
  0x31   :  { %v167_v21 = vpop.eup %166 }
  0x32   :  { %v82_v22 = vmul.f32 %v167_v21, %v80_v20 }
  0x34   :  { %v83_v23 = vmul.f32 %v167_v21, %v82_v22 }
  0x36   :  { %v84_v24 = vmul.f32 0.5, %v83_v23 }
  0x38   :  { %v85_v25 = vsub.f32 1.5, %v84_v24 }
  0x3a   :  { %v86_v26 = vmul.f32 %v167_v21, %v85_v25 }
  0x3c   :  { %v87_v28 = vmul.f32 %v86_v26, %v80_v20 }
  0x3e   :  { %v89_v29 = vsel %vm88_vm3, %v80_v20, %v87_v28 }
  0x3f   :  { %v92_v31 = vsel %vm90_vm4, %v91_v27, %v89_v29 }
  0x40   :  { %v94_v32 = vmul.f32 0.38941833, %v92_v31 }
  0x42   :  { %v95_v34 = vsub.f32 %v93_v30, %v94_v32 }
  0x44   :  { %v98_v35 = vsel %vm96_vm5, %v95_v34, %v158_v33 }
  0x45   :  { %v99_v36 = vsub.f32 %v98_v35, %v76_v16 }
  0x47   :  { %v100_v37 = vsel %vm64_vm1, %v99_v36, 0.0  ;;  %v101_v38 = vsel %vm65_vm2, %v99_v36, 0.0  ;;  %v120_v55 = vadd.f32 %v99_v36, %v76_v16 }
  0x48   :  { %v102_v39 = vadd.f32 %v100_v37, %v57_v4  ;;  %v103_v40 = vadd.f32 %v101_v38, %v58_v5 }
  0x49   :  { %v121_v57 = vmul.f32 32.0, %v120_v55 }
  0x4a   :  { %v104_v41 = vmul.f32 32.0, %v102_v39  ;;  %v105_v42 = vmul.f32 32.0, %v103_v40 }
  0x4c   :  { %v106_v43 = vmul.f32 1.442695, %v104_v41  ;;  %v108_v44 = vmul.f32 1.442695, %v105_v42 }
  0x4e   :  { %168 = vpow2.f32 %v106_v43 }
  0x4f   :  { %170 = vpow2.f32 %v108_v44 }
  0x54   :  { %v169_v45 = vpop.eup %168 }
  0x55   :  { %v171_v46 = vpop.eup %170 }
  0x56   :  { %v110_v47 = vsel %vm68_vm0, %v171_v46, 0.0 }
  0x57   :  { %v111_v48 = vadd.f32 %v169_v45, %v110_v47 }
  0x59   :  { %v112_v49 = vrot.slane %v111_v48, 4 }
  0x5b   :  { %v113_v50 = vadd.f32 %v112_v49, %v111_v48 }
  0x5d   :  { %v114_v51 = vrot.slane %v113_v50, 2 }
  0x5f   :  { %v115_v52 = vadd.f32 %v114_v51, %v113_v50 }
  0x61   :  { %v116_v53 = vrot.slane %v115_v52, 1 }
  0x63   :  { %v117_v54 = vadd.f32 %v116_v53, %v115_v52 }
  0x65   :  { %172 = vlog2.f32 %v117_v54 }
  0x6b   :  { %v173_v58 = vpop.eup %172 }
  0x6c   :  { %v119_v59 = vmul.f32 0.6931472, %v173_v58 }
  0x6e   :  { %v122_v61 = vsub.f32 %v119_v59, %v121_v57 }
  0x70   :  { %v128_v62 = vsel %vm127_vm6, %v122_v61, 0.0 }
  0x71   :  { %v129_v63 = vadd.f32 %v128_v62, %v56_v60 }
  0x73   :  { %130 = vst [vmem:[#allocation2] sm:$0x1] %v129_v63 }
  0x7a   :  { %v134_v1 = vld [vmem:[#allocation2] sm:$0x1] }
  0x7b   :  { %v136_v2 = vsel %vm135_vm7, %v134_v1, 0.0 }
  0x7c   :  { %137 = vadd.xlane.f32.xlu0 %v136_v2 }
  0xef   :  { %v138_v0 = vpop.xlane.xlu0 %137 }
  0xf0   :  { %139 = vst [vmem:[#allocation8] sm:$0x1] %v138_v0 }
  0xf1   :  { %150 = dma.vmem_to_hbm [thread:$0]  %s146_s1, 16, %s148_s23, [#allocation5]  }
  0xf2   :  { %250 = dma.done.wait [#allocation5], 16  }
  0xf3   :  { %251 = vsyncadd [#allocation5], 4294967280 }
  0xf4   :  { %155 = vsyncpa [#allocation4], 1 }
  0xf5   :  { %156 = vsyncpa [#allocation7], 1 }
  0xf6   :  { %157 = vsyncpa [#allocation5], 1 }

</bundles_post_ra>
